<compile_context>
chip_gen: v7x
topology: tpu7x:2x2x1
jax: 0.10.0
libtpu: 0.0.40
codegen_flags: <defaults>
</compile_context>

<pallas_src>
import functools
import math

import jax
import jax.numpy as jnp
from jax.experimental import pallas as pl
from jax.experimental.pallas import tpu as pltpu

NUM_BLOCKS = 12


def _smpl_head_kernel(x_ref, xt_ref, w_ref, b_ref, out_ref, *, C, L):
    """Whole forward in one invocation; everything VMEM-resident.

    x, xt : (B, C)
    w     : (13C, 12C)  rows [0:C)  = fused first-layer weights W1w
                        rows [C: )  = block-lower-triangular prefix-sum matrix M
    b     : (2, 12C)    row 0 = fused first-layer bias, row 1 = cumulative bias c
    out   : (B, 12C)    lane-dense (12*C = 384 is a multiple of 128)
    """
    x = x_ref[...]
    xhmmr = x + xt_ref[...]                                   # computed once

    # Fused up1_1..up1_12 : single lane-dense MXU matmul + ReLU.
    # Static row slice at C (multiple of 8 sublanes) -> tile-aligned, free view.
    h = jnp.dot(xhmmr, w_ref[:C, :],
                preferred_element_type=jnp.float32) + b_ref[0:1, :]
    h = jnp.maximum(h, 0.0)
    # Dropout(p=0.5) is identity in eval mode.
    # TODO(synk): training-mode dropout (stochastic mask via pltpu.prng_*) not implemented.

    # xf_i = x + sum_{j<=i}(h_j @ W2eff_j + b2eff_j), for all i at once:
    #   replicated-x term built in-kernel by a lane concat (no E operand, no extra
    #   MXU pass), h @ M is the block-prefix-sum of the 12 second linears, and
    #   b_ref[1] is the precomputed cumulative bias row.
    x_rep = jnp.concatenate([x] * L, axis=-1)                 # (B, 12C), VPU/XLU only
    out_ref[...] = (
        x_rep
        + jnp.dot(h, w_ref[C:, :], preferred_element_type=jnp.float32)
        + b_ref[1:2, :]
    )


def prepare_params(W1, b1, W2, b2):
    """One-time weight preprocessing (off the per-call path).

    W1, W2 : (12, C, C)  PyTorch Linear weights already transposed to (in, out).
    b1, b2 : (12, 1, C)
    Returns (W_cat, b_cat): two consolidated kernel operands.
    """
    L, C, _ = W1.shape
    assert L == NUM_BLOCKS

    # Block-10 quirk: second linear of block 10 applies up1_10 again (weight AND bias).
    W2_eff = W2.at[9].set(W1[9])
    b2_eff = b2.at[9].set(b1[9])

    # Fused first-layer weights/bias: column group i of the 12C axis is layer i.
    W1w = jnp.transpose(W1, (1, 0, 2)).reshape(C, L * C)      # (C, 12C)
    b1w = b1.reshape(1, L * C)                                # (1, 12C)

    # M[jC:(j+1)C, iC:(i+1)C] = W2_eff[j] if j <= i else 0   (block lower-triangular).
    mask = (jnp.arange(L)[:, None] <= jnp.arange(L)[None, :]).astype(W1.dtype)  # (L, L)
    M = mask[:, :, None, None] * W2_eff[:, None, :, :]        # (j, i, a, b)
    M = jnp.transpose(M, (0, 2, 1, 3)).reshape(L * C, L * C)  # (12C, 12C)

    # c[:, iC:(i+1)C] = sum_{j<=i} b2_eff[j]
    c = jnp.cumsum(b2_eff[:, 0, :], axis=0).reshape(1, L * C)  # (1, 12C)

    # Consolidate to two operands (fewer DMA descriptors / semaphore waits).
    W_cat = jnp.concatenate([W1w, M], axis=0)                 # (13C, 12C)
    b_cat = jnp.concatenate([b1w, c], axis=0)                 # (2, 12C)
    return W_cat, b_cat


def smpl_head_prediction(x, xt, params):
    """x, xt: (B, C) f32.  params: output of prepare_params.  Returns (B, 12, C) f32."""
    B, C = x.shape
    L = NUM_BLOCKS
    W_cat, b_cat = params

    itemsize = 4  # f32
    flops = 2 * B * (L * C) * (C + L * C)                     # two MXU matmuls
    bytes_accessed = itemsize * (
        x.size + xt.size + W_cat.size + b_cat.size + B * L * C
    )

    # Single invocation, no grid: 4 operands (<700 KiB total) DMA'd whole into VMEM;
    # output is lane-dense (B, 12C).  Per the review: do NOT re-tile across K/N —
    # compute is ~2.5 MFLOP and never saturates any unit; each extra grid step would
    # cost ~0.35 us of pipeline bookkeeping.
    # NOTE: amortize the batch-independent weight DMA by passing the largest batch
    # available at the call site; add a "parallel" batch grid axis (per-core block a
    # multiple of 8 rows) only if the production batch grows to hundreds+ (v7x 2nd TC).
    out_wide = pl.pallas_call(
        functools.partial(_smpl_head_kernel, C=C, L=L),
        out_shape=jax.ShapeDtypeStruct((B, L * C), jnp.float32),
        in_specs=[pl.BlockSpec(memory_space=pltpu.MemorySpace.VMEM)] * 4,
        out_specs=pl.BlockSpec(memory_space=pltpu.MemorySpace.VMEM),
        cost_estimate=pl.CostEstimate(
            flops=flops, transcendentals=0, bytes_accessed=bytes_accessed),
    )(x, xt, W_cat, b_cat)

    # Row-major reshape (free) — replaces any (L,B,C)->(B,L,C) transpose.
    return out_wide.reshape(B, L, C)


def _reference(x, xt, W1, b1, W2, b2):
    """Pure-JAX reference mirroring the PyTorch forward (eval mode)."""
    xhmmr = x + xt
    acc = x
    outs = []
    for i in range(NUM_BLOCKS):
        h = jnp.maximum(xhmmr @ W1[i] + b1[i], 0.0)
        if i == 9:   # block 10 uses up1_10 again (original-module bug)
            w, b = W1[i], b1[i]
        else:
            w, b = W2[i], b2[i]
        acc = acc + h @ w + b
        outs.append(acc)
    return jnp.stack(outs, axis=1)


if __name__ == "__main__":
    key = jax.random.PRNGKey(0)
    B, C, L = 8, 32, NUM_BLOCKS   # in_channels = cfg.MODEL.SMPL_HEAD.IN_CHANNELS

    k_x, k_xt, k_w1, k_b1, k_w2, k_b2 = jax.random.split(key, 6)

    x = jax.random.normal(k_x, (B, C), jnp.float32)
    xt = jax.random.normal(k_xt, (B, C), jnp.float32)

    # up1_* : default Linear init scale; up2_* : xavier_uniform with gain=0.01
    W1 = jax.random.normal(k_w1, (L, C, C), jnp.float32) * (1.0 / math.sqrt(C))
    b1 = jax.random.normal(k_b1, (L, 1, C), jnp.float32) * 0.01
    xavier_bound = 0.01 * math.sqrt(6.0 / (C + C))
    W2 = jax.random.uniform(k_w2, (L, C, C), jnp.float32,
                            minval=-xavier_bound, maxval=xavier_bound)
    b2 = jax.random.normal(k_b2, (L, 1, C), jnp.float32) * 0.01

    params = prepare_params(W1, b1, W2, b2)   # one-time, off the forward path
    params = jax.block_until_ready(params)

    out = smpl_head_prediction(x, xt, params)
    out = jax.block_until_ready(out)

    ref = _reference(x, xt, W1, b1, W2, b2)
    assert out.shape == (B, L, C), out.shape
    max_err = float(jnp.max(jnp.abs(out - ref)))
    assert jnp.allclose(out, ref, atol=1e-4, rtol=1e-4), max_err

    print("KERNEL_OK")
</pallas_src>

<mosaic_0001>
module attributes {stable_mosaic.version = 11 : i64} {
  func.func @_smpl_head_kernel(%arg0: memref<8x32xf32, #tpu.memory_space<vmem>>, %arg1: memref<8x32xf32, #tpu.memory_space<vmem>>, %arg2: memref<416x384xf32, #tpu.memory_space<vmem>>, %arg3: memref<2x384xf32, #tpu.memory_space<vmem>>, %arg4: memref<8x384xf32, #tpu.memory_space<vmem>>) attributes {dimension_semantics = [], scalar_prefetch = 0 : i64, scratch_operands = 0 : i64, tpu.core_type = #tpu.core_type<tc>} {
    %c0 = arith.constant 0 : index
    %c0_0 = arith.constant 0 : index
    %0 = vector.load %arg0[%c0, %c0_0] : memref<8x32xf32, #tpu.memory_space<vmem>>, vector<8x32xf32>
    %c0_1 = arith.constant 0 : index
    %c0_2 = arith.constant 0 : index
    %1 = vector.load %arg1[%c0_1, %c0_2] : memref<8x32xf32, #tpu.memory_space<vmem>>, vector<8x32xf32>
    %2 = arith.addf %0, %1 : vector<8x32xf32>
    %c0_3 = arith.constant 0 : index
    %c0_4 = arith.constant 0 : index
    %3 = vector.load %arg2[%c0_3, %c0_4] : memref<416x384xf32, #tpu.memory_space<vmem>>, vector<32x384xf32>
    %cst = arith.constant dense<0.000000e+00> : vector<8x384xf32>
    %4 = tpu.matmul %2, %3, %cst {dimension_numbers = #tpu.dot_dimension_numbers<[1], [0], [0], [1], [0, 0, 1, 1], [], []>} : vector<8x32xf32>, vector<32x384xf32>, vector<8x384xf32> -> vector<8x384xf32>
    %c0_5 = arith.constant 0 : index
    %c0_6 = arith.constant 0 : index
    %5 = vector.load %arg3[%c0_5, %c0_6] : memref<2x384xf32, #tpu.memory_space<vmem>>, vector<1x384xf32>
    %6 = vector.broadcast %5 : vector<1x384xf32> to vector<8x384xf32>
    %7 = arith.addf %4, %6 : vector<8x384xf32>
    %cst_7 = arith.constant 0.000000e+00 : f32
    %8 = vector.broadcast %cst_7 : f32 to vector<8x384xf32>
    %9 = arith.maximumf %7, %8 : vector<8x384xf32>
    %10 = tpu.concatenate %0, %0, %0, %0, %0, %0, %0, %0, %0, %0, %0, %0 in 1 : vector<8x32xf32>, vector<8x32xf32>, vector<8x32xf32>, vector<8x32xf32>, vector<8x32xf32>, vector<8x32xf32>, vector<8x32xf32>, vector<8x32xf32>, vector<8x32xf32>, vector<8x32xf32>, vector<8x32xf32>, vector<8x32xf32> -> vector<8x384xf32>
    %c32 = arith.constant 32 : index
    %c0_8 = arith.constant 0 : index
    %11 = vector.load %arg2[%c32, %c0_8] : memref<416x384xf32, #tpu.memory_space<vmem>>, vector<384x384xf32>
    %cst_9 = arith.constant dense<0.000000e+00> : vector<8x384xf32>
    %12 = tpu.matmul %9, %11, %cst_9 {dimension_numbers = #tpu.dot_dimension_numbers<[1], [0], [0], [1], [0, 0, 1, 1], [], []>} : vector<8x384xf32>, vector<384x384xf32>, vector<8x384xf32> -> vector<8x384xf32>
    %13 = arith.addf %10, %12 : vector<8x384xf32>
    %c1 = arith.constant 1 : index
    %c0_10 = arith.constant 0 : index
    %14 = vector.load %arg3[%c1, %c0_10] : memref<2x384xf32, #tpu.memory_space<vmem>>, vector<1x384xf32>
    %15 = vector.broadcast %14 : vector<1x384xf32> to vector<8x384xf32>
    %16 = arith.addf %13, %15 : vector<8x384xf32>
    %c0_11 = arith.constant 0 : index
    %c0_12 = arith.constant 0 : index
    %17 = vector.load %arg4[%c0_11, %c0_12] : memref<8x384xf32, #tpu.memory_space<vmem>>, vector<8x384xf32>
    tpu.vector_store %arg4[%c0_11, %c0_12], %16 {strides = array<i32>} : memref<8x384xf32, #tpu.memory_space<vmem>>, vector<8x384xf32>,
    return
  }
}

</mosaic_0001>

<bundles_post_ra>
// kernel: tpu_custom_call.1
= control target key start
LH: loop header
LB: loop body
LE: loop exit
PB: predicated region body
PF: predicated region fallthrough
CT: control target
= control target key end

     0   :  { %9 = vsyncpa [#allocation3], 0  ;;  %s1237_s0 = inlined_call_operand.hbm [shape: f32[8,32], index: 0, kind: input, shape index: {}]   ;;  %s1238_s1 = inlined_call_operand.hbm [shape: f32[8,32], index: 1, kind: input, shape index: {}]   ;;  %s1239_s2 = inlined_call_operand.hbm [shape: f32[416,384], index: 2, kind: input, shape index: {}]   ;;  %s1240_s3 = inlined_call_operand.vmem [shape: f32[2,384], index: 3, kind: input, shape index: {}]   ;;  %s1241_s4 = inlined_call_operand.hbm [shape: f32[8,384], index: 4, kind: output, shape index: {}]  }
   0x1   :  { %10 = vsyncpa [#allocation6], 0 }
   0x2   :  { %11 = vsyncpa [#allocation4], 0  ;;  %s1099_s15 = smov [#allocation5]   ;;  %s1100_s17 = smov [#allocation2]  }
   0x3   :  { %s28_s16 = sshll.u32 %s1099_s15, 4  ;;  %s18_s18 = sshll.u32 %s1100_s17, 4  ;;  %s29_s16 = int_to_ptr.vmem [resolvable:$true] %s28_s16  ;;  %s19_s18 = int_to_ptr.vmem [resolvable:$true] %s18_s18 }
   0x4   :  { %s1005_s21 = scalar_lea.hbm %s1238_s1, 128 }
   0x5   :  { %p1006_p0 = scmp.ne.s32.totalorder %s1238_s1, %s1005_s21  ;;  %p1009_p1 = scmp.lt.u32.totalorder %s1005_s21, %s1238_s1 }
   0x7   :  { %p1011_p2 = pnand %p1009_p1, %p1006_p0 }
   0x9   :  { %1014 = shalt.err (!%p1011_p2)
}
   0xa   :  { %s1015_s26 = scalar_lea.vmem %s29_s16, 128  ;;  %p1020_p4 = scmp.lt.s32.totalorder %s29_s16, %s29_s16 }
   0xb   :  { %p1016_p3 = scmp.ne.s32.totalorder %s29_s16, %s1015_s26  ;;  %p1021_p5 = scmp.lt.s32.totalorder %s1015_s26, %s1015_s26 }
   0xd   :  { %p1022_p6 = por %p1021_p5, %p1020_p4 }
   0xf   :  { %p1023_p7 = pnand %p1022_p6, %p1016_p3 }
  0x11   :  { %1026 = shalt.err (!%p1023_p7)
}
  0x12   :  { %31 = dma.hbm_to_vmem [thread:$0]  %s1238_s1, 128, %s29_s16, [#allocation6]  }
  0x13   :  { %s1027_s5 = scalar_lea.hbm %s1237_s0, 128 }
  0x14   :  { %p1028_p8 = scmp.ne.s32.totalorder %s1237_s0, %s1027_s5  ;;  %p1031_p9 = scmp.lt.u32.totalorder %s1027_s5, %s1237_s0 }
  0x16   :  { %p1033_p10 = pnand %p1031_p9, %p1028_p8 }
  0x18   :  { %1036 = shalt.err (!%p1033_p10)
}
  0x19   :  { %s1037_s10 = scalar_lea.vmem %s19_s18, 128  ;;  %p1042_p12 = scmp.lt.s32.totalorder %s19_s18, %s19_s18 }
  0x1a   :  { %p1038_p11 = scmp.ne.s32.totalorder %s19_s18, %s1037_s10  ;;  %p1043_p13 = scmp.lt.s32.totalorder %s1037_s10, %s1037_s10 }
  0x1c   :  { %p1044_p0 = por %p1043_p13, %p1042_p12 }
  0x1e   :  { %p1045_p1 = pnand %p1044_p0, %p1038_p11 }
  0x20   :  { %1048 = shalt.err (!%p1045_p1)
}
  0x21   :  { %21 = dma.hbm_to_vmem [thread:$0]  %s1237_s0, 128, %s19_s18, [#allocation3]  }
  0x22   :  { %s1101_s12 = smov [#allocation7]   ;;  %s1049_s16 = scalar_lea.hbm %s1239_s2, 19968 }
  0x23   :  { %s37_s13 = sshll.u32 %s1101_s12, 4  ;;  %p1050_p2 = scmp.ne.s32.totalorder %s1239_s2, %s1049_s16  ;;  %s38_s13 = int_to_ptr.vmem [resolvable:$true] %s37_s13 }
  0x24   :  { %p1053_p3 = scmp.lt.u32.totalorder %s1049_s16, %s1239_s2 }
  0x26   :  { %p1055_p4 = pnand %p1053_p3, %p1050_p2 }
  0x28   :  { %1058 = shalt.err (!%p1055_p4)
}
  0x29   :  { %s1059_s22 = scalar_lea.vmem %s38_s13, 19968  ;;  %p1064_p6 = scmp.lt.s32.totalorder %s38_s13, %s38_s13 }
  0x2a   :  { %p1060_p5 = scmp.ne.s32.totalorder %s38_s13, %s1059_s22  ;;  %p1065_p7 = scmp.lt.s32.totalorder %s1059_s22, %s1059_s22 }
  0x2c   :  { %p1066_p8 = por %p1065_p7, %p1064_p6 }
  0x2e   :  { %p1067_p9 = pnand %p1066_p8, %p1060_p5 }
  0x30   :  { %1070 = shalt.err (!%p1067_p9)
}
  0x31   :  { %s1102_s0 = smov 384   ;;  %s1103_s18 = smov 24  }
  0x32   :  { %43 = dma.hbm_to_vmem [thread:$0]  %s1239_s2, 19968, %s38_s13, [#allocation6], %s1102_s0, %s1102_s0, %s1103_s18  }
  0x33   :  { %1093 = dma.done.wait [#allocation3], 128  }
  0x34   :  { %1094 = vsyncadd [#allocation3], 4294967168 }
  0x35   :  { %1095 = dma.done.wait [#allocation6], 20096  }
  0x36   :  { %1096 = vsyncadd [#allocation6], 4294947200  ;;  %v1104_v0 = vmov 0.0   ;;  %v59_v1 = vld [vmem:[#allocation7 + $0x8] sm:$0xff]  ;;  %v62_v2 = vld [vmem:[#allocation7 + $0x20] sm:$0xff]  ;;  %vm87_vm0 = vcmask 261120  }
  0x37   :  { %155 = vmatprep.mubr.f32.mxu1 %v1104_v0  ;;  %v58_v3 = vld [vmem:[#allocation7] sm:$0xff]  ;;  %v825_v4 = vpack.c.bf16 %v62_v2, %v59_v1  ;;  %v61_v5 = vld [vmem:[#allocation7 + $0x18] sm:$0xff]  ;;  %v68_v7 = vld [vmem:[#allocation7 + $0x50] sm:$0xff]  ;;  %v1105_v32 = vmov 0.0|0.0   ;;  %vm1106_vm1 = vmmov 0   ;;  %s1107_s2 = smov 32  }
  0x38   :  { %v65_v6 = vld [vmem:[#allocation7 + $0x38] sm:$0xff]  ;;  %v827_v8 = vpack.c.bf16 %v61_v5, %v58_v3  ;;  %v64_v10 = vld [vmem:[#allocation7 + $0x30] sm:$0xff]  ;;  %v67_v11 = vld [vmem:[#allocation7 + $0x48] sm:$0xff]  ;;  %s1108_s25 = smov 96   ;;  %s1109_s26 = smov 64   ;;  %vm246_vm2 = vcmask 523264  }
  0x39   :  { %v829_v9 = vpack.c.bf16 %v68_v7, %v65_v6  ;;  %826 = vmatprep.subr.bf16.mxu1 %v825_v4  ;;  %v1173_v12 = vld [vmem:[#allocation2] sm:$0xff]  ;;  %v56_v13 = vld [vmem:[#allocation5] sm:$0xff]  ;;  %v831_v14 = vpack.c.bf16 %v67_v11, %v64_v10  ;;  %v63_v16 = vld [vmem:[#allocation7 + $0x28] sm:$0xff]  ;;  %vm248_vm3 = vcmask 785408   ;;  %s1110_s5 = smov [#allocation8]  }
  0x3a   :  { %828 = vmatpush1.bf16.msra.mxu1 %v827_v8  ;;  %v60_v15 = vld [vmem:[#allocation7 + $0x10] sm:$0xff]  ;;  %v251_v17 = vld [vmem:[#allocation7 + $0x68] sm:$0xff]  ;;  %v254_v18 = vld [vmem:[#allocation7 + $0x80] sm:$0xff]  ;;  %v57_v26 = vadd.f32 %v56_v13, %v1173_v12  ;;  %236 = vrot.lane.b32.xlu0 %v1173_v12, %s1107_s2  ;;  %s709_s6 = sshll.u32 %s1110_s5, 4  ;;  %s710_s6 = int_to_ptr.vmem [resolvable:$true] %s709_s6 }
  0x3b   :  { %830 = vmatprep.subr.bf16.mxu1 %v829_v9  ;;  %v250_v19 = vld [vmem:[#allocation7 + $0x60] sm:$0xff]  ;;  %v253_v20 = vld [vmem:[#allocation7 + $0x78] sm:$0xff]  ;;  %v839_v21 = vpack.c.bf16 %v254_v18, %v251_v17  ;;  %v260_v24 = vld [vmem:[#allocation7 + $0xb0] sm:$0xff]  ;;  %v834_v31 = vpack.c.bf16 %v63_v16, %v60_v15  ;;  %242 = vrot.lane.b32.xlu1 %v1173_v12, %s1108_s25  ;;  %p1076_p11 = scmp.lt.s32.totalorder %s710_s6, %s710_s6 }
  0x3c   :  { %v841_v22 = vpack.c.bf16 %v253_v20, %v250_v19  ;;  %v257_v23 = vld [vmem:[#allocation7 + $0x98] sm:$0xff]  ;;  %v256_v25 = vld [vmem:[#allocation7 + $0x90] sm:$0xff]  ;;  %v259_v28 = vld [vmem:[#allocation7 + $0xa8] sm:$0xff] }
  0x3d   :  { %v843_v27 = vpack.c.bf16 %v260_v24, %v257_v23  ;;  %v263_v29 = vld [vmem:[#allocation7 + $0xc8] sm:$0xff]  ;;  %v266_v30 = vld [vmem:[#allocation7 + $0xe0] sm:$0xff]  ;;  %840 = vmatprep.subr.bf16.mxu0 %v839_v21  ;;  %v69_v34 = vld [vmem:[#allocation7 + $0x58] sm:$0xff]  ;;  %v845_v35 = vpack.c.bf16 %v259_v28, %v256_v25 }
  0x3e   :  { %832 = vmatpush1.bf16.msra.mxu1 %v831_v14  ;;  %v66_v33 = vld [vmem:[#allocation7 + $0x40] sm:$0xff]  ;;  %842 = vmatpush1.bf16.msra.mxu0 %v841_v22  ;;  %v847_v36 = vpack.c.bf16 %v266_v30, %v263_v29  ;;  %v265_v38 = vld [vmem:[#allocation7 + $0xd8] sm:$0xff]  ;;  %v272_v40 = vld [vmem:[#allocation7 + $0x110] sm:$0xff] }
  0x3f   :  { %833 = vmatprep.subr.bf16.mxu1 %v1105_v32  ;;  %844 = vmatprep.subr.bf16.mxu0 %v843_v27  ;;  %v262_v37 = vld [vmem:[#allocation7 + $0xc0] sm:$0xff]  ;;  %v269_v39 = vld [vmem:[#allocation7 + $0xf8] sm:$0xff]  ;;  %v837_v41 = vpack.c.bf16 %v69_v34, %v66_v33  ;;  %v268_v44 = vld [vmem:[#allocation7 + $0xf0] sm:$0xff] }
  0x40   :  { %v849_v42 = vpack.c.bf16 %v265_v38, %v262_v37  ;;  %v851_v43 = vpack.c.bf16 %v272_v40, %v269_v39  ;;  %v271_v45 = vld [vmem:[#allocation7 + $0x108] sm:$0xff]  ;;  %v278_v47 = vld [vmem:[#allocation7 + $0x140] sm:$0xff]  ;;  %v300_v48 = vld [vmem:[#allocation7 + $0x1f0] sm:$0xff]  ;;  %239 = vrot.lane.b32.xlu0 %v1173_v12, %s1109_s26 }
  0x41   :  { %719 = vmatmul.mubr.msk.f32.vlgmr.msra.gmra.mrb[0].mxu1 %vm87_vm0, %v57_v26  ;;  %v275_v46 = vld [vmem:[#allocation7 + $0x128] sm:$0xff]  ;;  %v853_v50 = vpack.c.bf16 %v271_v45, %v268_v44  ;;  %v252_v52 = vld [vmem:[#allocation7 + $0x70] sm:$0xff]  ;;  %v274_v55 = vld [vmem:[#allocation7 + $0x120] sm:$0xff] }
  0x42   :  { %835 = vmatpush3.bf16.msra.mxu1 %v834_v31  ;;  %787 = vmatprep.mubr.msk.f32.mxu1 %vm1106_vm1, %v1104_v0  ;;  %v303_v49 = vld [vmem:[#allocation7 + $0x208] sm:$0xff]  ;;  %v855_v54 = vpack.c.bf16 %v278_v47, %v275_v46  ;;  %v277_v56 = vld [vmem:[#allocation7 + $0x138] sm:$0xff]  ;;  %v306_v58 = vld [vmem:[#allocation7 + $0x220] sm:$0xff] }
  0x43   :  { %836 = vmatprep.subr.bf16.mxu1 %v1105_v32  ;;  %846 = vmatpush1.bf16.msra.mxu0 %v845_v35  ;;  %v935_v51 = vpack.c.bf16 %v303_v49, %v300_v48  ;;  %v255_v53 = vld [vmem:[#allocation7 + $0x88] sm:$0xff]  ;;  %v281_v59 = vld [vmem:[#allocation7 + $0x158] sm:$0xff]  ;;  %v284_v60 = vld [vmem:[#allocation7 + $0x170] sm:$0xff]  ;;  %v857_v2 = vpack.c.bf16 %v277_v56, %v274_v55 }
  0x44   :  { %848 = vmatprep.subr.bf16.mxu0 %v847_v36  ;;  %v937_v57 = vpack.c.bf16 %v255_v53, %v252_v52  ;;  %v309_v61 = vld [vmem:[#allocation7 + $0x238] sm:$0xff]  ;;  %v258_v63 = vld [vmem:[#allocation7 + $0xa0] sm:$0xff]  ;;  %v312_v4 = vld [vmem:[#allocation7 + $0x250] sm:$0xff]  ;;  %v859_v6 = vpack.c.bf16 %v284_v60, %v281_v59 }
  0x45   :  { %v939_v62 = vpack.c.bf16 %v309_v61, %v306_v58  ;;  %v261_v1 = vld [vmem:[#allocation7 + $0xb8] sm:$0xff]  ;;  %v315_v5 = vld [vmem:[#allocation7 + $0x268] sm:$0xff]  ;;  %v280_v7 = vld [vmem:[#allocation7 + $0x150] sm:$0xff] }
  0x46   :  { %838 = vmatpush3.bf16.msra.mxu1 %v837_v41  ;;  %v941_v3 = vpack.c.bf16 %v261_v1, %v258_v63  ;;  %v283_v8 = vld [vmem:[#allocation7 + $0x168] sm:$0xff]  ;;  %v943_v9 = vpack.c.bf16 %v315_v5, %v312_v4  ;;  %v264_v10 = vld [vmem:[#allocation7 + $0xd0] sm:$0xff]  ;;  %v290_v13 = vld [vmem:[#allocation7 + $0x1a0] sm:$0xff] }
  0x47   :  { %850 = vmatpush1.bf16.msra.mxu0 %v849_v42  ;;  %936 = vmatprep.subr.bf16.mxu1 %v935_v51  ;;  %v287_v11 = vld [vmem:[#allocation7 + $0x188] sm:$0xff]  ;;  %v318_v16 = vld [vmem:[#allocation7 + $0x280] sm:$0xff]  ;;  %v321_v17 = vld [vmem:[#allocation7 + $0x298] sm:$0xff]  ;;  %v861_v18 = vpack.c.bf16 %v283_v8, %v280_v7 }
  0x48   :  { %852 = vmatprep.subr.bf16.mxu0 %v851_v43  ;;  %v267_v14 = vld [vmem:[#allocation7 + $0xe8] sm:$0xff]  ;;  %v947_v19 = vpack.c.bf16 %v321_v17, %v318_v16  ;;  %v270_v20 = vld [vmem:[#allocation7 + $0x100] sm:$0xff]  ;;  %v273_v21 = vld [vmem:[#allocation7 + $0x118] sm:$0xff]  ;;  %v863_v22 = vpack.c.bf16 %v290_v13, %v287_v11 }
  0x49   :  { %788 = vmatmul.mubr.msk.f32.vlgmr.msra.gmra.mrb[2].mxu1 %vm87_vm0, %v57_v26  ;;  %v945_v15 = vpack.c.bf16 %v267_v14, %v264_v10  ;;  %v286_v23 = vld [vmem:[#allocation7 + $0x180] sm:$0xff]  ;;  %v289_v24 = vld [vmem:[#allocation7 + $0x198] sm:$0xff]  ;;  %v324_v25 = vld [vmem:[#allocation7 + $0x2b0] sm:$0xff]  ;;  %v949_v29 = vpack.c.bf16 %v273_v21, %v270_v20 }
  0x4a   :  { %938 = vmatpush3.bf16.msra.mxu1 %v937_v57  ;;  %v293_v26 = vld [vmem:[#allocation7 + $0x1b8] sm:$0xff]  ;;  %v296_v27 = vld [vmem:[#allocation7 + $0x1d0] sm:$0xff]  ;;  %v327_v28 = vld [vmem:[#allocation7 + $0x2c8] sm:$0xff]  ;;  %v865_v30 = vpack.c.bf16 %v289_v24, %v286_v23 }
  0x4b   :  { %854 = vmatpush1.bf16.msra.mxu0 %v853_v50  ;;  %940 = vmatprep.subr.bf16.mxu1 %v939_v62  ;;  %v292_v31 = vld [vmem:[#allocation7 + $0x1b0] sm:$0xff]  ;;  %v951_v33 = vpack.c.bf16 %v327_v28, %v324_v25  ;;  %v279_v35 = vld [vmem:[#allocation7 + $0x148] sm:$0xff]  ;;  %v867_v36 = vpack.c.bf16 %v296_v27, %v293_v26  ;;  %v330_v38 = vld [vmem:[#allocation7 + $0x2e0] sm:$0xff] }
  0x4c   :  { %856 = vmatprep.subr.bf16.mxu0 %v855_v54  ;;  %v276_v34 = vld [vmem:[#allocation7 + $0x130] sm:$0xff]  ;;  %v295_v37 = vld [vmem:[#allocation7 + $0x1c8] sm:$0xff]  ;;  %v333_v39 = vld [vmem:[#allocation7 + $0x2f8] sm:$0xff] }
  0x4d   :  { %v299_v40 = vld [vmem:[#allocation7 + $0x1e8] sm:$0xff]  ;;  %v302_v41 = vld [vmem:[#allocation7 + $0x200] sm:$0xff]  ;;  %v953_v42 = vpack.c.bf16 %v279_v35, %v276_v34  ;;  %v869_v43 = vpack.c.bf16 %v295_v37, %v292_v31  ;;  %v955_v45 = vpack.c.bf16 %v333_v39, %v330_v38  ;;  %v285_v47 = vld [vmem:[#allocation7 + $0x178] sm:$0xff] }
  0x4e   :  { %942 = vmatpush3.bf16.msra.mxu1 %v941_v3  ;;  %v298_v44 = vld [vmem:[#allocation7 + $0x1e0] sm:$0xff]  ;;  %v871_v48 = vpack.c.bf16 %v302_v41, %v299_v40  ;;  %v301_v49 = vld [vmem:[#allocation7 + $0x1f8] sm:$0xff]  ;;  %v336_v50 = vld [vmem:[#allocation7 + $0x310] sm:$0xff] }
  0x4f   :  { %858 = vmatpush1.bf16.msra.mxu0 %v857_v2  ;;  %944 = vmatprep.subr.bf16.mxu1 %v943_v9  ;;  %v282_v46 = vld [vmem:[#allocation7 + $0x160] sm:$0xff]  ;;  %v339_v51 = vld [vmem:[#allocation7 + $0x328] sm:$0xff]  ;;  %v305_v52 = vld [vmem:[#allocation7 + $0x218] sm:$0xff]  ;;  %v873_v55 = vpack.c.bf16 %v301_v49, %v298_v44 }
  0x50   :  { %860 = vmatprep.subr.bf16.mxu0 %v859_v6  ;;  %v308_v53 = vld [vmem:[#allocation7 + $0x230] sm:$0xff]  ;;  %v957_v54 = vpack.c.bf16 %v285_v47, %v282_v46  ;;  %v959_v56 = vpack.c.bf16 %v339_v51, %v336_v50  ;;  %v291_v58 = vld [vmem:[#allocation7 + $0x1a8] sm:$0xff]  ;;  %v314_v63 = vld [vmem:[#allocation7 + $0x260] sm:$0xff] }
  0x51   :  { %v288_v57 = vld [vmem:[#allocation7 + $0x190] sm:$0xff]  ;;  %v875_v59 = vpack.c.bf16 %v308_v53, %v305_v52  ;;  %v307_v61 = vld [vmem:[#allocation7 + $0x228] sm:$0xff]  ;;  %v310_v4 = vld [vmem:[#allocation7 + $0x240] sm:$0xff] }
  0x52   :  { %946 = vmatpush3.bf16.msra.mxu1 %v945_v15  ;;  %v304_v60 = vld [vmem:[#allocation7 + $0x210] sm:$0xff]  ;;  %v311_v62 = vld [vmem:[#allocation7 + $0x248] sm:$0xff]  ;;  %v961_v1 = vpack.c.bf16 %v291_v58, %v288_v57  ;;  %v313_v5 = vld [vmem:[#allocation7 + $0x258] sm:$0xff] }
  0x53   :  { %862 = vmatpush1.bf16.msra.mxu0 %v861_v18  ;;  %948 = vmatprep.subr.bf16.mxu1 %v947_v19  ;;  %v877_v2 = vpack.c.bf16 %v307_v61, %v304_v60  ;;  %v879_v3 = vpack.c.bf16 %v314_v63, %v311_v62  ;;  %v317_v6 = vld [vmem:[#allocation7 + $0x278] sm:$0xff]  ;;  %v320_v7 = vld [vmem:[#allocation7 + $0x290] sm:$0xff]  ;;  %v881_v8 = vpack.c.bf16 %v313_v5, %v310_v4  ;;  %v319_v11 = vld [vmem:[#allocation7 + $0x288] sm:$0xff] }
  0x54   :  { %864 = vmatprep.subr.bf16.mxu0 %v863_v22  ;;  %v883_v9 = vpack.c.bf16 %v320_v7, %v317_v6  ;;  %v316_v10 = vld [vmem:[#allocation7 + $0x270] sm:$0xff]  ;;  %v323_v13 = vld [vmem:[#allocation7 + $0x2a8] sm:$0xff]  ;;  %v326_v14 = vld [vmem:[#allocation7 + $0x2c0] sm:$0xff] }
  0x55   :  { %v885_v15 = vpack.c.bf16 %v319_v11, %v316_v10  ;;  %v887_v16 = vpack.c.bf16 %v326_v14, %v323_v13  ;;  %v322_v17 = vld [vmem:[#allocation7 + $0x2a0] sm:$0xff]  ;;  %v325_v18 = vld [vmem:[#allocation7 + $0x2b8] sm:$0xff]  ;;  %v332_v20 = vld [vmem:[#allocation7 + $0x2f0] sm:$0xff] }
  0x56   :  { %950 = vmatpush3.bf16.msra.mxu1 %v949_v29  ;;  %v329_v19 = vld [vmem:[#allocation7 + $0x2d8] sm:$0xff]  ;;  %v889_v21 = vpack.c.bf16 %v325_v18, %v322_v17  ;;  %v328_v23 = vld [vmem:[#allocation7 + $0x2d0] sm:$0xff]  ;;  %v331_v24 = vld [vmem:[#allocation7 + $0x2e8] sm:$0xff] }
  0x57   :  { %866 = vmatpush1.bf16.msra.mxu0 %v865_v30  ;;  %952 = vmatprep.subr.bf16.mxu1 %v951_v33  ;;  %v891_v22 = vpack.c.bf16 %v332_v20, %v329_v19  ;;  %v335_v25 = vld [vmem:[#allocation7 + $0x308] sm:$0xff]  ;;  %v338_v26 = vld [vmem:[#allocation7 + $0x320] sm:$0xff]  ;;  %v893_v27 = vpack.c.bf16 %v331_v24, %v328_v23  ;;  %v337_v30 = vld [vmem:[#allocation7 + $0x318] sm:$0xff] }
  0x58   :  { %868 = vmatprep.subr.bf16.mxu0 %v867_v36  ;;  %v895_v28 = vpack.c.bf16 %v338_v26, %v335_v25  ;;  %v334_v29 = vld [vmem:[#allocation7 + $0x300] sm:$0xff]  ;;  %v341_v33 = vld [vmem:[#allocation7 + $0x338] sm:$0xff]  ;;  %v344_v34 = vld [vmem:[#allocation7 + $0x350] sm:$0xff] }
  0x59   :  { %v897_v31 = vpack.c.bf16 %v337_v30, %v334_v29  ;;  %v342_v35 = vld [vmem:[#allocation7 + $0x340] sm:$0xff]  ;;  %v899_v36 = vpack.c.bf16 %v344_v34, %v341_v33  ;;  %v345_v37 = vld [vmem:[#allocation7 + $0x358] sm:$0xff]  ;;  %v340_v38 = vld [vmem:[#allocation7 + $0x330] sm:$0xff] }
  0x5a   :  { %954 = vmatpush3.bf16.msra.mxu1 %v953_v42  ;;  %v343_v39 = vld [vmem:[#allocation7 + $0x348] sm:$0xff]  ;;  %v963_v40 = vpack.c.bf16 %v345_v37, %v342_v35  ;;  %v294_v42 = vld [vmem:[#allocation7 + $0x1c0] sm:$0xff]  ;;  %v1192_v51 = vld [vmem:[%s1240_s3] ss:$2 sm:$0x7] }
  0x5b   :  { %870 = vmatpush1.bf16.msra.mxu0 %v869_v43  ;;  %956 = vmatprep.subr.bf16.mxu1 %v955_v45  ;;  %v901_v41 = vpack.c.bf16 %v343_v39, %v340_v38  ;;  %v297_v43 = vld [vmem:[#allocation7 + $0x1d8] sm:$0xff]  ;;  %v347_v45 = vld [vmem:[#allocation7 + $0x368] sm:$0xff]  ;;  %v350_v46 = vld [vmem:[#allocation7 + $0x380] sm:$0xff] }
  0x5c   :  { %872 = vmatprep.subr.bf16.mxu0 %v871_v48  ;;  %v965_v44 = vpack.c.bf16 %v297_v43, %v294_v42  ;;  %v903_v47 = vpack.c.bf16 %v350_v46, %v347_v45  ;;  %v72_v48 = vlaneseq  ;;  %v348_v60 = vld [vmem:[#allocation7 + $0x370] sm:$0xff]  ;;  %v351_v61 = vld [vmem:[#allocation7 + $0x388] sm:$0xff]  ;;  %v353_v63 = vld [vmem:[#allocation7 + $0x398] sm:$0xff] }
  0x5d   :  { %v968_v4 = vpack.c.bf16 %v351_v61, %v348_v60  ;;  %v352_v5 = vld [vmem:[#allocation7 + $0x390] sm:$0xff]  ;;  %v357_v10 = vld [vmem:[#allocation7 + $0x3b8] sm:$0xff]  ;;  %v359_v11 = vld [vmem:[#allocation7 + $0x3c8] sm:$0xff] }
  0x5e   :  { %958 = vmatpush3.bf16.msra.mxu1 %v957_v54  ;;  %v1186_v49 = vshrl.u32 %v72_v48, 7  ;;  %v362_v13 = vld [vmem:[#allocation7 + $0x3e0] sm:$0xff]  ;;  %v361_v19 = vld [vmem:[#allocation7 + $0x3d8] sm:$0xff]  ;;  %v360_v20 = vld [vmem:[#allocation7 + $0x3d0] sm:$0xff] }
  0x5f   :  { %874 = vmatpush1.bf16.msra.mxu0 %v873_v55  ;;  %960 = vmatprep.subr.bf16.mxu1 %v959_v56  ;;  %v346_v56 = vld [vmem:[#allocation7 + $0x360] sm:$0xff]  ;;  %v911_v18 = vpack.c.bf16 %v362_v13, %v359_v11  ;;  %v365_v23 = vld [vmem:[#allocation7 + $0x3f8] sm:$0xff]  ;;  %v368_v24 = vld [vmem:[#allocation7 + $0x410] sm:$0xff] }
  0x60   :  { %876 = vmatprep.subr.bf16.mxu0 %v875_v59  ;;  %v74_v50 = vsub.s32 0, %v1186_v49  ;;  %v78_v52 = vsub.s32 1, %v1186_v49  ;;  %v349_v59 = vld [vmem:[#allocation7 + $0x378] sm:$0xff]  ;;  %v367_v29 = vld [vmem:[#allocation7 + $0x408] sm:$0xff]  ;;  %v366_v30 = vld [vmem:[#allocation7 + $0x400] sm:$0xff] }
  0x61   :  { %v371_v33 = vld [vmem:[#allocation7 + $0x428] sm:$0xff]  ;;  %v374_v34 = vld [vmem:[#allocation7 + $0x440] sm:$0xff]  ;;  %v373_v38 = vld [vmem:[#allocation7 + $0x438] sm:$0xff] }
  0x62   :  { %962 = vmatpush3.bf16.msra.mxu1 %v961_v1  ;;  %v75_v53 = vrot.slane %v1192_v51, %v74_v50  ;;  %v79_v54 = vrot.slane %v1192_v51, %v78_v52  ;;  %v356_v1 = vld [vmem:[#allocation7 + $0x3b0] sm:$0xff]  ;;  %v370_v37 = vld [vmem:[#allocation7 + $0x420] sm:$0xff]  ;;  %v385_v61 = vld [vmem:[#allocation7 + $0x498] sm:$0xff] }
  0x63   :  { %878 = vmatpush1.bf16.msra.mxu0 %v877_v2  ;;  %964 = vmatprep.subr.bf16.mxu1 %v963_v40  ;;  %v907_v7 = vpack.c.bf16 %v356_v1, %v353_v63  ;;  %v372_v39 = vld [vmem:[#allocation7 + $0x430] sm:$0xff]  ;;  %v375_v40 = vld [vmem:[#allocation7 + $0x448] sm:$0xff]  ;;  %v921_v43 = vpack.c.bf16 %v373_v38, %v370_v37  ;;  %v378_v48 = vld [vmem:[#allocation7 + $0x460] sm:$0xff] }
  0x64   :  { %880 = vmatprep.subr.bf16.mxu0 %v879_v3  ;;  %v905_v3 = vpack.c.bf16 %v349_v59, %v346_v56  ;;  %v380_v42 = vld [vmem:[#allocation7 + $0x470] sm:$0xff]  ;;  %v82_v56 = vsub.s32 2, %v1186_v49  ;;  %v382_v59 = vld [vmem:[#allocation7 + $0x480] sm:$0xff]  ;;  %v387_v63 = vld [vmem:[#allocation7 + $0x4a8] sm:$0xff] }
  0x65   :  { %v376_v45 = vld [vmem:[#allocation7 + $0x450] sm:$0xff]  ;;  %v389_v1 = vld [vmem:[#allocation7 + $0x4b8] sm:$0xff] }
  0x66   :  { %966 = vmatpush3.bf16.msra.mxu1 %v965_v44  ;;  %v980_v44 = vpack.c.bf16 %v375_v40, %v372_v39 }
  0x67   :  { %882 = vmatpush1.bf16.msra.mxu0 %v881_v8  ;;  %967 = vmatprep.subr.bf16.mxu1 %v1105_v32  ;;  %v355_v8 = vld [vmem:[#allocation7 + $0x3a8] sm:$0xff] }
  0x68   :  { %884 = vmatprep.subr.bf16.mxu0 %v883_v9  ;;  %v354_v9 = vld [vmem:[#allocation7 + $0x3a0] sm:$0xff]  ;;  %v909_v14 = vpack.c.bf16 %v355_v8, %v352_v5  ;;  %v391_v8 = vld [vmem:[#allocation7 + $0x4c8] sm:$0xff] }
  0x6b   :  { %886 = vmatpush1.bf16.msra.mxu0 %v885_v15  ;;  %v971_v15 = vpack.c.bf16 %v357_v10, %v354_v9  ;;  %v390_v9 = vld [vmem:[#allocation7 + $0x4c0] sm:$0xff]  ;;  %v393_v10 = vld [vmem:[#allocation7 + $0x4d8] sm:$0xff] }
  0x6c   :  { %888 = vmatprep.subr.bf16.mxu0 %v887_v16  ;;  %v358_v16 = vld [vmem:[#allocation7 + $0x3c0] sm:$0xff] }
  0x6d   :  { %v913_v25 = vpack.c.bf16 %v361_v19, %v358_v16 }
  0x6f   :  { %890 = vmatpush1.bf16.msra.mxu0 %v889_v21  ;;  %v363_v21 = vld [vmem:[#allocation7 + $0x3e8] sm:$0xff] }
  0x70   :  { %892 = vmatprep.subr.bf16.mxu0 %v891_v22  ;;  %v974_v26 = vpack.c.bf16 %v363_v21, %v360_v20 }
  0x73   :  { %894 = vmatpush1.bf16.msra.mxu0 %v893_v27  ;;  %v364_v27 = vld [vmem:[#allocation7 + $0x3f0] sm:$0xff] }
  0x74   :  { %896 = vmatprep.subr.bf16.mxu0 %v895_v28  ;;  %v915_v28 = vpack.c.bf16 %v368_v24, %v365_v23  ;;  %v917_v35 = vpack.c.bf16 %v367_v29, %v364_v27 }
  0x77   :  { %898 = vmatpush1.bf16.msra.mxu0 %v897_v31  ;;  %v369_v31 = vld [vmem:[#allocation7 + $0x418] sm:$0xff] }
  0x78   :  { %900 = vmatprep.subr.bf16.mxu0 %v899_v36  ;;  %v977_v36 = vpack.c.bf16 %v369_v31, %v366_v30 }
  0x7b   :  { %902 = vmatpush1.bf16.msra.mxu0 %v901_v41  ;;  %v377_v41 = vld [vmem:[#allocation7 + $0x458] sm:$0xff] }
  0x7c   :  { %904 = vmatprep.subr.bf16.mxu0 %v903_v47  ;;  %v923_v46 = vpack.c.bf16 %v380_v42, %v377_v41  ;;  %v379_v47 = vld [vmem:[#allocation7 + $0x468] sm:$0xff] }
  0xac   :  { %v237_v19 = vpop.permute.xlu0 %236 }
  0xad   :  { %v245_v20 = vsel %vm87_vm0, %v1173_v12, %v237_v19 }
 0x114   :  { %v157_v55 = vpop.f32.mrb[0].mxu1 }
 0x115   :  { %v158_v57 = vadd.f32 %v157_v55, %v75_v53  ;;  %v159_v58 = vpop.f32.mrb[1].mxu1  ;;  %v381_v53 = vld [vmem:[#allocation7 + $0x478] sm:$0xff]  ;;  %v386_v55 = vld [vmem:[#allocation7 + $0x4a0] sm:$0xff] }
 0x116   :  { %v160_v62 = vadd.f32 %v159_v58, %v79_v54  ;;  %v383_v54 = vld [vmem:[#allocation7 + $0x488] sm:$0xff]  ;;  %v983_v58 = vpack.c.bf16 %v381_v53, %v378_v48 }
 0x117   :  { %v232_v6 = vmax.f32 %v158_v57, 0.0  ;;  %v925_v57 = vpack.c.bf16 %v379_v47, %v376_v45  ;;  %v927_v60 = vpack.c.bf16 %v386_v55, %v383_v54 }
 0x118   :  { %v233_v2 = vmax.f32 %v160_v62, 0.0  ;;  %v384_v62 = vld [vmem:[#allocation7 + $0x490] sm:$0xff] }
 0x119   :  { %v986_v5 = vpack.c.bf16 %v387_v63, %v384_v62 }
 0x11a   :  { %458 = vmatprep.mubr.f32.mxu0 %v233_v2  ;;  %600 = vmatprep.mubr.f32.mxu1 %v233_v2  ;;  %v392_v2 = vld [vmem:[#allocation7 + $0x4d0] sm:$0xff] }
 0x11b   :  { %459 = vmatmul.mubr.f32.vlgmr.msra.gmra.mrb[0].mxu0 %v232_v6  ;;  %601 = vmatmul.mubr.f32.vlgmr.msra.gmra.mrb[4].mxu1 %v232_v6  ;;  %v388_v6 = vld [vmem:[#allocation7 + $0x4b0] sm:$0xff] }
 0x11c   :  { %906 = vmatpush1.bf16.msra.mxu0 %v905_v3  ;;  %969 = vmatpush3.bf16.msra.mxu1 %v968_v4  ;;  %v1201_v17 = vpop.f32.mrb[2].mxu1  ;;  %v83_v3 = vrot.slane %v1192_v51, %v82_v56  ;;  %v929_v4 = vpack.c.bf16 %v385_v61, %v382_v59  ;;  %v933_v13 = vpack.c.bf16 %v391_v8, %v388_v6 }
 0x11d   :  { %908 = vmatprep.subr.bf16.mxu0 %v907_v7  ;;  %970 = vmatprep.subr.bf16.mxu1 %v1105_v32  ;;  %v789_v22 = vpop.f32.mrb[3].mxu1  ;;  %v931_v7 = vpack.c.bf16 %v392_v2, %v389_v1 }
 0x11e   :  { %529 = vmatprep.mubr.f32.mxu0 %v1104_v0  ;;  %822 = vmatprep.mubr.msk.f32.mxu1 %vm1106_vm1, %v1104_v0  ;;  %v919_v0 = vpack.c.bf16 %v374_v34, %v371_v33  ;;  %v229_v11 = vadd.f32 %v1201_v17, %v83_v3  ;;  %v240_v17 = vpop.permute.xlu0 %239  ;;  %v243_v22 = vpop.permute.xlu1 %242 }
 0x11f   :  { %v247_v21 = vsel %vm246_vm2, %v245_v20, %v240_v17 }
 0x120   :  { %910 = vmatpush1.bf16.msra.mxu0 %v909_v14  ;;  %972 = vmatpush3.bf16.msra.mxu1 %v971_v15  ;;  %v989_v14 = vpack.c.bf16 %v393_v10, %v390_v9  ;;  %v234_v51 = vmax.f32 %v229_v11, 0.0  ;;  %v249_v23 = vsel %vm248_vm3, %v247_v21, %v243_v22 }
 0x121   :  { %912 = vmatprep.subr.bf16.mxu0 %v911_v18  ;;  %973 = vmatprep.subr.bf16.mxu1 %v1105_v32 }
 0x124   :  { %914 = vmatpush1.bf16.msra.mxu0 %v913_v25  ;;  %975 = vmatpush3.bf16.msra.mxu1 %v974_v26 }
 0x125   :  { %916 = vmatprep.subr.bf16.mxu0 %v915_v28  ;;  %976 = vmatprep.subr.bf16.mxu1 %v1105_v32 }
 0x128   :  { %918 = vmatpush1.bf16.msra.mxu0 %v917_v35  ;;  %978 = vmatpush3.bf16.msra.mxu1 %v977_v36 }
 0x129   :  { %920 = vmatprep.subr.bf16.mxu0 %v919_v0  ;;  %979 = vmatprep.subr.bf16.mxu1 %v1105_v32 }
 0x12c   :  { %922 = vmatpush1.bf16.msra.mxu0 %v921_v43  ;;  %981 = vmatpush3.bf16.msra.mxu1 %v980_v44 }
 0x12d   :  { %924 = vmatprep.subr.bf16.mxu0 %v923_v46  ;;  %982 = vmatprep.subr.bf16.mxu1 %v1105_v32 }
 0x130   :  { %926 = vmatpush1.bf16.msra.mxu0 %v925_v57  ;;  %984 = vmatpush3.bf16.msra.mxu1 %v983_v58 }
 0x131   :  { %928 = vmatprep.subr.bf16.mxu0 %v927_v60  ;;  %985 = vmatprep.subr.bf16.mxu1 %v1105_v32 }
 0x134   :  { %930 = vmatpush1.bf16.msra.mxu0 %v929_v4  ;;  %987 = vmatpush3.bf16.msra.mxu1 %v986_v5 }
 0x135   :  { %932 = vmatprep.subr.bf16.mxu0 %v931_v7  ;;  %988 = vmatprep.subr.bf16.mxu1 %v1105_v32  ;;  %v721_v32 = vld [vmem:[%s1240_s3 + $0x1] ss:$2 sm:$0x7]  ;;  %s1071_s3 = scalar_lea.vmem %s710_s6, 384 }
 0x136   :  { %v685_v24 = vrot.slane %v721_v32, %v74_v50  ;;  %v689_v27 = vrot.slane %v721_v32, %v78_v52  ;;  %v693_v29 = vrot.slane %v721_v32, %v82_v56  ;;  %p1072_p10 = scmp.ne.s32.totalorder %s710_s6, %s1071_s3  ;;  %p1077_p12 = scmp.lt.s32.totalorder %s1071_s3, %s1071_s3 }
 0x138   :  { %934 = vmatpush1.bf16.msra.mxu0 %v933_v13  ;;  %990 = vmatpush3.bf16.msra.mxu1 %v989_v14  ;;  %p1078_p13 = por %p1077_p12, %p1076_p11 }
 0x13a   :  { %p1079_p0 = pnand %p1078_p13, %p1072_p10 }
 0x13b   :  { %530 = vmatmul.mubr.f32.vlgmr.msra.gmra.mrb[0].mxu0 %v234_v51  ;;  %823 = vmatmul.mubr.f32.vlgmr.msra.gmra.mrb[6].mxu1 %v234_v51 }
 0x1ee   :  { %v759_v15 = vpop.f32.mrb[4].mxu1 }
 0x1ef   :  { %v760_v16 = vpop.f32.mrb[5].mxu1 }
 0x1f0   :  { %v761_v18 = vadd.f32 %v760_v16, %v759_v15 }
 0x20e   :  { %v531_v25 = vpop.f32.mrb[0].mxu0  ;;  %v672_v26 = vpop.f32.mrb[6].mxu1 }
 0x20f   :  { %v676_v28 = vadd.f32 %v531_v25, %v249_v23  ;;  %v673_v12 = vadd.f32 %v761_v18, %v672_v26  ;;  %v533_v30 = vpop.f32.mrb[1].mxu0  ;;  %v824_v31 = vpop.f32.mrb[7].mxu1 }
 0x210   :  { %v677_v33 = vadd.f32 %v533_v30, %v249_v23 }
 0x211   :  { %v697_v34 = vadd.f32 %v685_v24, %v676_v28  ;;  %v678_v35 = vadd.f32 %v673_v12, %v249_v23 }
 0x212   :  { %v698_v36 = vadd.f32 %v689_v27, %v677_v33 }
 0x213   :  { %700 = vst [vmem:[#allocation8] sm:$0xff] %v697_v34  ;;  %v699_v37 = vadd.f32 %v693_v29, %v678_v35 }
 0x214   :  { %701 = vst [vmem:[#allocation8 + $0x8] sm:$0xff] %v698_v36 }
 0x215   :  { %702 = vst [vmem:[#allocation8 + $0x10] sm:$0xff] %v699_v37 }
 0x216   :  { %1082 = shalt.err (!%p1079_p0)
}
 0x217   :  { %s1083_s9 = scalar_lea.hbm %s1241_s4, 384 }
 0x218   :  { %p1084_p1 = scmp.ne.s32.totalorder %s1241_s4, %s1083_s9  ;;  %p1087_p2 = scmp.lt.u32.totalorder %s1083_s9, %s1241_s4 }
 0x21a   :  { %p1089_p3 = pnand %p1087_p2, %p1084_p1 }
 0x21c   :  { %1092 = shalt.err (!%p1089_p3)
}
 0x21d   :  { %712 = dma.vmem_to_hbm [thread:$0]  %s710_s6, 384, %s1241_s4, [#allocation4]  }
 0x21e   :  { %1097 = dma.done.wait [#allocation4], 384  }
 0x21f   :  { %1098 = vsyncadd [#allocation4], 4294966912 }
 0x220   :  { %716 = vsyncpa [#allocation3], 1 }
 0x221   :  { %717 = vsyncpa [#allocation6], 1 }
 0x222   :  { %718 = vsyncpa [#allocation4], 1 }

</bundles_post_ra>
